<compile_context>
chip_gen: v7x
topology: tpu7x:2x2x1
jax: 0.10.0
libtpu: 0.0.40
codegen_flags: <defaults>
</compile_context>

<pallas_src>
import functools
import math

import numpy as np
import jax
import jax.numpy as jnp
from jax import lax
from jax.experimental import pallas as pl
from jax.experimental.pallas import tpu as pltpu


def _soft_vq_kernel(h_ref, wp_ref, bp_ref, ets_ref, e_ref, wi_ref, bi_ref,
                    q_ref, code_ref, *, mxu_dtype):
    """One (n, t) tile: native-layout transpose -> proj -> L2 norm ->
    soft-VQ attention -> A@E -> proj_inv."""
    fast = np.dtype(mxu_dtype) != np.dtype(jnp.float32)

    # Fused layout change: block arrives as (C, tT); one XLU transpose gives
    # row-major tokens (tT, C).  Cast for the MXU after the transpose.
    ht = jnp.transpose(h_ref[0]).astype(mxu_dtype)                        # (tT, C)

    # proj(h) + row L2 normalization (rsqrt -> EUP slot in fast mode).
    hp = jnp.dot(ht, wp_ref[...], preferred_element_type=jnp.float32) + bp_ref[...]
    row_sq = jnp.maximum(jnp.sum(hp * hp, axis=1, keepdims=True), 1e-30)  # (tT, 1)
    if fast:
        hn = hp * lax.rsqrt(row_sq)                                       # (tT, D)
    else:
        hn = hp / jnp.sqrt(row_sq)

    # logits = 2 * hn.e / temperature.  The per-row ||h||^2 and the uniform
    # ||e||^2 == 1 shifts are dropped (softmax is row-shift invariant) and the
    # 2/temperature factor is pre-folded into ets in the wrapper, so the
    # logits come straight out of the MXU.
    logits = jnp.dot(hn.astype(mxu_dtype), ets_ref[...],
                     preferred_element_type=jnp.float32)                  # (tT, K)
    m = jnp.max(logits, axis=1, keepdims=True)                            # (tT, 1)
    p = jnp.exp(logits - m)                                               # (tT, K)
    sum_p = jnp.sum(p, axis=1, keepdims=True)                             # (tT, 1)

    # code = argmax(A) == argmax(logits); first-index tie semantics.
    # (1, K) iota broadcast in the where (no (tT, K) int iota regenerated).
    K = logits.shape[1]
    iota = lax.broadcasted_iota(jnp.int32, (1, K), 1)
    code_ref[0] = jnp.min(jnp.where(logits == m, iota, K), axis=1, keepdims=True)

    # Soft quantization ('train' mode) with the softmax normalization deferred
    # past A @ E: the (tT, K) divide becomes a (tT, D) multiply + reciprocal.
    hv = jnp.dot(p.astype(mxu_dtype), e_ref[...],
                 preferred_element_type=jnp.float32)                      # (tT, D)
    if fast:
        h_vq = hv * pl.reciprocal(sum_p, approx=True)
    else:
        h_vq = hv / sum_p

    # proj_inv
    q = jnp.dot(h_vq.astype(mxu_dtype), wi_ref[...],
                preferred_element_type=jnp.float32) + bi_ref[...]
    q_ref[0] = q.astype(q_ref.dtype)                                      # (tT, C)


def soft_vq_forward(h, proj_w, proj_b, emb_w, proj_inv_w, proj_inv_b,
                    temperature=1.0, tile_t=1024, mxu_dtype=jnp.bfloat16):
    """h: (N, embedding_dim, T) in the module's NATIVE layout (no wrapper
    transpose).  Returns (quantized (N,T,embedding_dim), vq_code (N,T) int32,
    vq_loss=0.0).  Default forward path only (attn_mask=None, mode='train').

    mxu_dtype: operand dtype for the four MXU matmuls (f32 accumulation).
    bf16 (default) is the production setting; jnp.float32 for strict checks.
    If the surrounding model runs bf16, pass h in bf16 — the streamed input
    and the quantized output keep h.dtype, halving their HBM traffic."""
    N, C, T = h.shape
    D, C2 = proj_w.shape
    assert C2 == C, "proj weight must be (vq_dim, embedding_dim)"
    K = emb_w.shape[0]
    mdt = np.dtype(mxu_dtype)

    # Token-axis tile: full T when it fits, otherwise a lane-aligned chunk.
    # (Production: 1024-2048; on v7x keep num tiles >= ~8 to feed both TCs.)
    if T <= tile_t:
        tT = T
    else:
        tT = max(128, (int(tile_t) // 128) * 128)
    num_t = -(-T // tT)
    Tp = num_t * tT
    if Tp != T:
        # TODO(synk): only triggers when T > tile_t and tile_t does not divide
        # T; pick tile_t | T to avoid this extra HBM pad copy.
        h = jnp.pad(h, ((0, 0), (0, 0), (0, Tp - T)))

    # Constants hoisted out of the kernel: normalized codebook (both layouts,
    # the transposed one pre-scaled by 2/temperature), and pre-transposed
    # Linear weights.  (torch renormalizes embedding.weight in-place; here we
    # only use the normalized copy for compute — parameter mutation is the
    # caller's business.)
    emb_n = emb_w / jnp.linalg.norm(emb_w, axis=-1, keepdims=True)        # (K, D)
    wp_t = proj_w.T.astype(mdt)                                           # (C, D)
    bp = proj_b.reshape(1, D).astype(jnp.float32)
    ets = (emb_n.T * (2.0 / float(temperature))).astype(mdt)              # (D, K)
    e_mm = emb_n.astype(mdt)                                              # (K, D)
    wi_t = proj_inv_w.T.astype(mdt)                                       # (D, C)
    bi = proj_inv_b.reshape(1, C).astype(jnp.float32)

    cost = pl.CostEstimate(
        flops=2 * N * Tp * (C * D + D * K + K * D + D * C),
        transcendentals=N * Tp * (K + 2),
        bytes_accessed=(2 * N * Tp * C * h.dtype.itemsize
                        + 4 * N * Tp
                        + mdt.itemsize * (2 * C * D + 2 * K * D)
                        + 4 * (D + C)),
    )

    kernel = functools.partial(_soft_vq_kernel, mxu_dtype=mdt)
    const = lambda n, t: (0, 0)

    q_out, code_out = pl.pallas_call(
        kernel,
        grid=(N, num_t),
        in_specs=[
            pl.BlockSpec((1, C, tT), lambda n, t: (n, 0, t)),  # native-layout activations
            pl.BlockSpec((C, D), const),                       # proj weight (transposed)
            pl.BlockSpec((1, D), const),                       # proj bias
            pl.BlockSpec((D, K), const),                       # 2/T * codebook^T (logits)
            pl.BlockSpec((K, D), const),                       # codebook (A @ E)
            pl.BlockSpec((D, C), const),                       # proj_inv weight (transposed)
            pl.BlockSpec((1, C), const),                       # proj_inv bias
        ],
        out_specs=(
            pl.BlockSpec((1, tT, C), lambda n, t: (n, t, 0)),  # quantized tokens (lane-dense for C%128==0)
            pl.BlockSpec((1, tT, 1), lambda n, t: (n, t, 0)),  # vq codes
        ),
        out_shape=(
            jax.ShapeDtypeStruct((N, Tp, C), h.dtype),
            jax.ShapeDtypeStruct((N, Tp, 1), jnp.int32),
        ),
        compiler_params=pltpu.CompilerParams(
            dimension_semantics=("parallel", "parallel"),      # no cross-tile state
            vmem_limit_bytes=32 * 1024 * 1024,                 # v7x-safe budget
        ),
        cost_estimate=cost,
    )(h, wp_t, bp, ets, e_mm, wi_t, bi)

    quantized = q_out[:, :T, :]
    vq_code = code_out[:, :T, 0]                               # int32 (torch returns int64)
    vq_loss = jnp.float32(0.0)
    return quantized, vq_code, vq_loss


def _reference_forward(h, proj_w, proj_b, emb_w, proj_inv_w, proj_inv_b,
                       temperature=1.0):
    """Pure-JAX mirror of SoftVQLayer.forward (attn_mask=None, mode='train')."""
    N, C, T = h.shape
    D = proj_w.shape[0]
    hp = jnp.transpose(h, (0, 2, 1)) @ proj_w.T + proj_b                  # (N, T, D)
    hp = hp / jnp.linalg.norm(hp, axis=-1, keepdims=True)
    h_flat = hp.reshape(-1, D)
    emb_n = emb_w / jnp.linalg.norm(emb_w, axis=-1, keepdims=True)
    d = (jnp.sum(h_flat ** 2, axis=1, keepdims=True)
         + jnp.sum(emb_n ** 2, axis=1)
         - 2.0 * h_flat @ emb_n.T)
    A = jax.nn.softmax(-d / temperature, axis=1)
    code = jnp.argmax(A, axis=-1)
    h_vq = A @ emb_n
    quantized = h_vq.reshape(N, T, D) @ proj_inv_w.T + proj_inv_b         # (N, T, C)
    return quantized, code.reshape(N, T), 0.0


if __name__ == "__main__":
    num_embeddings, embedding_dim, vq_dim = 256, 128, 64
    N, T = 2, 64
    temperature = 1.0

    key = jax.random.PRNGKey(0)
    k1, k2, k3, k4, k5, k6 = jax.random.split(key, 6)

    # nn.Linear default init: U(-1/sqrt(fan_in), 1/sqrt(fan_in))
    lim_p = 1.0 / math.sqrt(embedding_dim)
    proj_w = jax.random.uniform(k1, (vq_dim, embedding_dim), jnp.float32, -lim_p, lim_p)
    proj_b = jax.random.uniform(k2, (vq_dim,), jnp.float32, -lim_p, lim_p)
    lim_i = 1.0 / math.sqrt(vq_dim)
    proj_inv_w = jax.random.uniform(k3, (embedding_dim, vq_dim), jnp.float32, -lim_i, lim_i)
    proj_inv_b = jax.random.uniform(k4, (embedding_dim,), jnp.float32, -lim_i, lim_i)
    # embedding.weight ~ U(-1/num_embeddings, 1/num_embeddings)
    emb_w = jax.random.uniform(k5, (num_embeddings, vq_dim), jnp.float32,
                               -1.0 / num_embeddings, 1.0 / num_embeddings)
    h = jax.random.normal(k6, (N, embedding_dim, T), jnp.float32)

    # Production path: bf16 MXU operands (the default).
    q_bf, code_bf, loss_bf = soft_vq_forward(
        h, proj_w, proj_b, emb_w, proj_inv_w, proj_inv_b, temperature=temperature)

    # Strict-precision path used for the exact correctness guard.
    q_f32, code_f32, loss_f32 = soft_vq_forward(
        h, proj_w, proj_b, emb_w, proj_inv_w, proj_inv_b, temperature=temperature,
        mxu_dtype=jnp.float32)
    jax.block_until_ready((q_bf, code_bf, q_f32, code_f32))

    # Correctness guard against the pure-JAX reference.
    q_gold, code_gold, loss_gold = _reference_forward(
        h, proj_w, proj_b, emb_w, proj_inv_w, proj_inv_b, temperature)

    assert q_f32.shape == (N, T, embedding_dim)
    assert jnp.allclose(q_f32, q_gold, rtol=1e-4, atol=1e-5), "f32 quantized mismatch"
    assert jnp.array_equal(code_f32, code_gold.astype(code_f32.dtype)), "f32 vq_code mismatch"

    # bf16-operand path: relaxed tolerances (argmax may flip on rare near-ties).
    assert q_bf.shape == (N, T, embedding_dim)
    assert jnp.allclose(q_bf, q_gold, rtol=3e-2, atol=3e-3), "bf16 quantized mismatch"
    agree = float(jnp.mean((code_bf == code_gold.astype(code_bf.dtype)).astype(jnp.float32)))
    assert agree >= 0.9, f"bf16 vq_code agreement too low: {agree}"

    assert float(loss_bf) == 0.0 and float(loss_f32) == 0.0 and float(loss_gold) == 0.0

    print("KERNEL_OK")
</pallas_src>

<mosaic_0001>
module attributes {stable_mosaic.version = 11 : i64} {
  func.func @_soft_vq_kernel(%arg0: i32, %arg1: i32, %arg2: memref<1x128x64xf32, #tpu.memory_space<vmem>>, %arg3: memref<128x64xbf16, #tpu.memory_space<vmem>>, %arg4: memref<1x64xf32, #tpu.memory_space<vmem>>, %arg5: memref<64x256xbf16, #tpu.memory_space<vmem>>, %arg6: memref<256x64xbf16, #tpu.memory_space<vmem>>, %arg7: memref<64x128xbf16, #tpu.memory_space<vmem>>, %arg8: memref<1x128xf32, #tpu.memory_space<vmem>>, %arg9: memref<1x64x128xf32, #tpu.memory_space<vmem>>, %arg10: memref<1x64x1xi32, #tpu.memory_space<vmem>>) attributes {dimension_semantics = [#tpu.dimension_semantics<parallel>, #tpu.dimension_semantics<parallel>], iteration_bounds = array<i64: 2, 1>, scalar_prefetch = 0 : i64, scratch_operands = 0 : i64, tpu.core_type = #tpu.core_type<tc>, window_params = [{transform_indices = @transform_0, window_bounds = array<i64: 1, 128, 64>}, {pipeline_mode = #tpu.pipeline_mode<synchronous>, transform_indices = @transform_1, window_bounds = array<i64: 128, 64>}, {pipeline_mode = #tpu.pipeline_mode<synchronous>, transform_indices = @transform_2, window_bounds = array<i64: 1, 64>}, {pipeline_mode = #tpu.pipeline_mode<synchronous>, transform_indices = @transform_3, window_bounds = array<i64: 64, 256>}, {pipeline_mode = #tpu.pipeline_mode<synchronous>, transform_indices = @transform_4, window_bounds = array<i64: 256, 64>}, {pipeline_mode = #tpu.pipeline_mode<synchronous>, transform_indices = @transform_5, window_bounds = array<i64: 64, 128>}, {pipeline_mode = #tpu.pipeline_mode<synchronous>, transform_indices = @transform_6, window_bounds = array<i64: 1, 128>}, {transform_indices = @transform_7, window_bounds = array<i64: 1, 64, 128>}, {transform_indices = @transform_8, window_bounds = array<i64: 1, 64, 1>}]} {
    %c0 = arith.constant 0 : index
    %c0_0 = arith.constant 0 : index
    %c0_1 = arith.constant 0 : index
    %0 = vector.load %arg2[%c0, %c0_0, %c0_1] : memref<1x128x64xf32, #tpu.memory_space<vmem>>, vector<1x128x64xf32>
    %1 = vector.shape_cast %0 : vector<1x128x64xf32> to vector<128x64xf32>
    %2 = tpu.transpose %1, [1, 0] : vector<128x64xf32> -> vector<64x128xf32>
    %3 = arith.truncf %2 : vector<64x128xf32> to vector<64x128xbf16>
    %c0_2 = arith.constant 0 : index
    %c0_3 = arith.constant 0 : index
    %4 = vector.load %arg3[%c0_2, %c0_3] : memref<128x64xbf16, #tpu.memory_space<vmem>>, vector<128x64xbf16>
    %cst = arith.constant dense<0.000000e+00> : vector<64x64xf32>
    %5 = tpu.matmul %3, %4, %cst {dimension_numbers = #tpu.dot_dimension_numbers<[1], [0], [0], [1], [0, 0, 1, 1], [], []>} : vector<64x128xbf16>, vector<128x64xbf16>, vector<64x64xf32> -> vector<64x64xf32>
    %c0_4 = arith.constant 0 : index
    %c0_5 = arith.constant 0 : index
    %6 = vector.load %arg4[%c0_4, %c0_5] : memref<1x64xf32, #tpu.memory_space<vmem>>, vector<1x64xf32>
    %7 = vector.broadcast %6 : vector<1x64xf32> to vector<64x64xf32>
    %8 = arith.addf %5, %7 : vector<64x64xf32>
    %9 = arith.mulf %8, %8 : vector<64x64xf32>
    %cst_6 = arith.constant dense<0.000000e+00> : vector<64xf32>
    %10 = vector.multi_reduction <add>, %9, %cst_6 [1] : vector<64x64xf32> to vector<64xf32>
    %11 = vector.shape_cast %10 : vector<64xf32> to vector<64x1xf32>
    %cst_7 = arith.constant 1.000000e-30 : f32
    %12 = vector.broadcast %cst_7 : f32 to vector<64x1xf32>
    %13 = arith.maximumf %11, %12 : vector<64x1xf32>
    %14 = math.rsqrt %13 : vector<64x1xf32>
    %15 = vector.broadcast %14 : vector<64x1xf32> to vector<64x64xf32>
    %16 = arith.mulf %8, %15 : vector<64x64xf32>
    %17 = arith.truncf %16 : vector<64x64xf32> to vector<64x64xbf16>
    %c0_8 = arith.constant 0 : index
    %c0_9 = arith.constant 0 : index
    %18 = vector.load %arg5[%c0_8, %c0_9] : memref<64x256xbf16, #tpu.memory_space<vmem>>, vector<64x256xbf16>
    %cst_10 = arith.constant dense<0.000000e+00> : vector<64x256xf32>
    %19 = tpu.matmul %17, %18, %cst_10 {dimension_numbers = #tpu.dot_dimension_numbers<[1], [0], [0], [1], [0, 0, 1, 1], [], []>} : vector<64x64xbf16>, vector<64x256xbf16>, vector<64x256xf32> -> vector<64x256xf32>
    %cst_11 = arith.constant dense<0xFF800000> : vector<64xf32>
    %20 = vector.multi_reduction <maximumf>, %19, %cst_11 [1] : vector<64x256xf32> to vector<64xf32>
    %21 = vector.shape_cast %20 : vector<64xf32> to vector<64x1xf32>
    %22 = vector.broadcast %21 : vector<64x1xf32> to vector<64x256xf32>
    %23 = arith.subf %19, %22 : vector<64x256xf32>
    %24 = math.exp %23 : vector<64x256xf32>
    %cst_12 = arith.constant dense<0.000000e+00> : vector<64xf32>
    %25 = vector.multi_reduction <add>, %24, %cst_12 [1] : vector<64x256xf32> to vector<64xf32>
    %26 = vector.shape_cast %25 : vector<64xf32> to vector<64x1xf32>
    %27 = tpu.iota {dimensions = array<i32: 1>} : vector<1x256xi32>
    %28 = vector.broadcast %21 : vector<64x1xf32> to vector<64x256xf32>
    %29 = arith.cmpf oeq, %19, %28 : vector<64x256xf32>
    %c256_i32 = arith.constant 256 : i32
    %30 = vector.shape_cast %27 : vector<1x256xi32> to vector<1x256xi32>
    %31 = vector.broadcast %30 : vector<1x256xi32> to vector<64x256xi32>
    %32 = vector.broadcast %c256_i32 : i32 to vector<64x256xi32>
    %33 = arith.select %29, %31, %32 : vector<64x256xi1>, vector<64x256xi32>
    %cst_13 = arith.constant dense<2147483647> : vector<64xi32>
    %34 = vector.multi_reduction <minsi>, %33, %cst_13 [1] : vector<64x256xi32> to vector<64xi32>
    %35 = vector.shape_cast %34 : vector<64xi32> to vector<64x1xi32>
    %c0_14 = arith.constant 0 : index
    %c0_15 = arith.constant 0 : index
    %c0_16 = arith.constant 0 : index
    %36 = vector.load %arg10[%c0_14, %c0_15, %c0_16] : memref<1x64x1xi32, #tpu.memory_space<vmem>>, vector<1x64x1xi32>
    %37 = vector.shape_cast %36 : vector<1x64x1xi32> to vector<64x1xi32>
    %38 = vector.shape_cast %35 : vector<64x1xi32> to vector<1x64x1xi32>
    tpu.vector_store %arg10[%c0_14, %c0_15, %c0_16], %38 {strides = array<i32>} : memref<1x64x1xi32, #tpu.memory_space<vmem>>, vector<1x64x1xi32>,
    %39 = arith.truncf %24 : vector<64x256xf32> to vector<64x256xbf16>
    %c0_17 = arith.constant 0 : index
    %c0_18 = arith.constant 0 : index
    %40 = vector.load %arg6[%c0_17, %c0_18] : memref<256x64xbf16, #tpu.memory_space<vmem>>, vector<256x64xbf16>
    %cst_19 = arith.constant dense<0.000000e+00> : vector<64x64xf32>
    %41 = tpu.matmul %39, %40, %cst_19 {dimension_numbers = #tpu.dot_dimension_numbers<[1], [0], [0], [1], [0, 0, 1, 1], [], []>} : vector<64x256xbf16>, vector<256x64xbf16>, vector<64x64xf32> -> vector<64x64xf32>
    %42 = tpu.reciprocal %26 {approx = true} : vector<64x1xf32> -> vector<64x1xf32>
    %43 = vector.broadcast %42 : vector<64x1xf32> to vector<64x64xf32>
    %44 = arith.mulf %41, %43 : vector<64x64xf32>
    %45 = arith.truncf %44 : vector<64x64xf32> to vector<64x64xbf16>
    %c0_20 = arith.constant 0 : index
    %c0_21 = arith.constant 0 : index
    %46 = vector.load %arg7[%c0_20, %c0_21] : memref<64x128xbf16, #tpu.memory_space<vmem>>, vector<64x128xbf16>
    %cst_22 = arith.constant dense<0.000000e+00> : vector<64x128xf32>
    %47 = tpu.matmul %45, %46, %cst_22 {dimension_numbers = #tpu.dot_dimension_numbers<[1], [0], [0], [1], [0, 0, 1, 1], [], []>} : vector<64x64xbf16>, vector<64x128xbf16>, vector<64x128xf32> -> vector<64x128xf32>
    %c0_23 = arith.constant 0 : index
    %c0_24 = arith.constant 0 : index
    %48 = vector.load %arg8[%c0_23, %c0_24] : memref<1x128xf32, #tpu.memory_space<vmem>>, vector<1x128xf32>
    %49 = vector.broadcast %48 : vector<1x128xf32> to vector<64x128xf32>
    %50 = arith.addf %47, %49 : vector<64x128xf32>
    %c0_25 = arith.constant 0 : index
    %c0_26 = arith.constant 0 : index
    %c0_27 = arith.constant 0 : index
    %51 = vector.load %arg9[%c0_25, %c0_26, %c0_27] : memref<1x64x128xf32, #tpu.memory_space<vmem>>, vector<1x64x128xf32>
    %52 = vector.shape_cast %51 : vector<1x64x128xf32> to vector<64x128xf32>
    %53 = vector.shape_cast %50 : vector<64x128xf32> to vector<1x64x128xf32>
    tpu.vector_store %arg9[%c0_25, %c0_26, %c0_27], %53 {strides = array<i32>} : memref<1x64x128xf32, #tpu.memory_space<vmem>>, vector<1x64x128xf32>,
    return
  }
  func.func @transform_0(%arg0: i32, %arg1: i32) -> (i32, i32, i32) {
    %c0_i32 = arith.constant 0 : i32
    %c0_i32_0 = arith.constant 0 : i32
    return %arg0, %c0_i32, %arg1 : i32, i32, i32
  }
  func.func @transform_1(%arg0: i32, %arg1: i32) -> (i32, i32) {
    %c0_i32 = arith.constant 0 : i32
    %c0_i32_0 = arith.constant 0 : i32
    %c0_i32_1 = arith.constant 0 : i32
    return %c0_i32, %c0_i32_0 : i32, i32
  }
  func.func @transform_2(%arg0: i32, %arg1: i32) -> (i32, i32) {
    %c0_i32 = arith.constant 0 : i32
    %c0_i32_0 = arith.constant 0 : i32
    %c0_i32_1 = arith.constant 0 : i32
    return %c0_i32, %c0_i32_0 : i32, i32
  }
  func.func @transform_3(%arg0: i32, %arg1: i32) -> (i32, i32) {
    %c0_i32 = arith.constant 0 : i32
    %c0_i32_0 = arith.constant 0 : i32
    %c0_i32_1 = arith.constant 0 : i32
    return %c0_i32, %c0_i32_0 : i32, i32
  }
  func.func @transform_4(%arg0: i32, %arg1: i32) -> (i32, i32) {
    %c0_i32 = arith.constant 0 : i32
    %c0_i32_0 = arith.constant 0 : i32
    %c0_i32_1 = arith.constant 0 : i32
    return %c0_i32, %c0_i32_0 : i32, i32
  }
  func.func @transform_5(%arg0: i32, %arg1: i32) -> (i32, i32) {
    %c0_i32 = arith.constant 0 : i32
    %c0_i32_0 = arith.constant 0 : i32
    %c0_i32_1 = arith.constant 0 : i32
    return %c0_i32, %c0_i32_0 : i32, i32
  }
  func.func @transform_6(%arg0: i32, %arg1: i32) -> (i32, i32) {
    %c0_i32 = arith.constant 0 : i32
    %c0_i32_0 = arith.constant 0 : i32
    %c0_i32_1 = arith.constant 0 : i32
    return %c0_i32, %c0_i32_0 : i32, i32
  }
  func.func @transform_7(%arg0: i32, %arg1: i32) -> (i32, i32, i32) {
    %c0_i32 = arith.constant 0 : i32
    %c0_i32_0 = arith.constant 0 : i32
    return %arg0, %arg1, %c0_i32 : i32, i32, i32
  }
  func.func @transform_8(%arg0: i32, %arg1: i32) -> (i32, i32, i32) {
    %c0_i32 = arith.constant 0 : i32
    %c0_i32_0 = arith.constant 0 : i32
    return %arg0, %arg1, %c0_i32 : i32, i32, i32
  }
}

</mosaic_0001>

<bundles_post_ra>
// kernel: tpu_custom_call.1
= control target key start
LH: loop header
LB: loop body
LE: loop exit
PB: predicated region body
PF: predicated region fallthrough
CT: control target
= control target key end

     0   :  { %14 = vsyncpa [#allocation3], 0  ;;  %s2462_s0 = inlined_call_operand.vmem [shape: f32[2,128,64], index: 0, kind: input, shape index: {}]   ;;  %s2463_s1 = inlined_call_operand.vmem [shape: bf16[128,64], index: 1, kind: input, shape index: {}]   ;;  %s2464_s2 = inlined_call_operand.vmem [shape: f32[1,64], index: 2, kind: input, shape index: {}]   ;;  %s2465_s3 = inlined_call_operand.vmem [shape: bf16[64,256], index: 3, kind: input, shape index: {}]   ;;  %s2466_s4 = inlined_call_operand.vmem [shape: bf16[256,64], index: 4, kind: input, shape index: {}]   ;;  %s2467_s5 = inlined_call_operand.vmem [shape: bf16[64,128], index: 5, kind: input, shape index: {}]   ;;  %s2468_s6 = inlined_call_operand.vmem [shape: f32[1,128], index: 6, kind: input, shape index: {}]   ;;  %s2469_s7 = inlined_call_operand.hbm [shape: f32[2,64,128], index: 7, kind: output, shape index: {0}]   ;;  %s2470_s8 = inlined_call_operand.vmem [shape: s32[2,64,1], index: 8, kind: output, shape index: {1}]  }
   0x1   :  { %16 = vsyncpa [#allocation3 + $0x1], 0  ;;  %s1950_s27 = smov 0   ;;  %s1952_s28 = smov 0  }
   0x2   :  { %s1954_s29 = smov 0   ;;  %s1956_s30 = smov 0  }
   0x3   :  { %s1958_s9 = smov 0   ;;  %s1960_s10 = smov 0  }
   0x4 LB: > { %s1495_s11 = sadd.s32 4294967295, %s1899_s10   ;;  %s1496_s12 = sadd.s32 4294967294, %s1899_s10   ;;  %s1899_s10 = sphi %s1960_s10, %s22_s10   ;;  %s1895_s9 = sphi %s1958_s9, %s2477_s9   ;;  %s1891_s30 = sphi %s1956_s30, %s2476_s30   ;;  %s1887_s29 = sphi %s1954_s29, %s2475_s29   ;;  %s1883_s28 = sphi %s1952_s28, %s2474_s28   ;;  %s1879_s27 = sphi %s1950_s27, %s2473_s27  }
   0x5   : > { %s34_s13 = sadd.s32 1, %s1895_s9  ;;  %s197_s14 = sadd.s32 1, %s1887_s29 }
   0x6   : > { %p36_p0 = scmp.ge.s32.totalorder %s34_s13, 2  ;;  %p207_p1 = scmp.ne.s32.totalorder %s1887_s29, %s1883_s28 }
   0x7   : > { %p208_p2 = scmp.eq.s32.totalorder %s1495_s11, 1  ;;  %p213_p3 = scmp.ne.s32.totalorder %s1883_s28, %s1879_s27 }
   0x8   : > { %s2479_s13 = smov (%p36_p0, %s34_s13), 0  ;;  %p214_p5 = scmp.eq.s32.totalorder %s1496_s12, 1 }
   0x9   : > { %p1990_p4 = por %p208_p2, %p207_p1  ;;  %s192_s16 = ssub.s32 %s1895_s9, %s2479_s13 }
   0xa   : > { %p1499_p6 = scmp.ge.s32.totalorder %s1899_s10, 1  ;;  %p195_p7 = scmp.eq.s32.totalorder %s192_s16, 0 }
   0xb   : > { %p1997_p8 = por %p214_p5, %p213_p3  ;;  %p289_p9 = scmp.lt.s32.totalorder %s1899_s10, 3 }
   0xc   : > { %s2003_s18 = scalar_select %p195_p7, %s1887_s29, %s197_s14  }
   0xd   : > { %p290_p10 = pnand %p1499_p6, %p289_p9 }
   0xe   : > { %p335_p11 = scmp.lt.s32.totalorder (!%p290_p10), %s1891_s30, 1  ;;  %v1717_v0 = vld [vmem:[%s2463_s1] sm:$0xff] (!%p290_p10)   ;;  %v1718_v1 = vld [vmem:[%s2463_s1 + $0x8] sm:$0xff] (!%p290_p10)   ;;  %v1719_v2 = vld [vmem:[%s2463_s1 + $0x10] sm:$0xff] (!%p290_p10)   ;;  %vm551_vm0 = vcmask (!%p290_p10), 523264   ;;  %s1558_s16 = sshll.u32 (!%p290_p10), %s1891_s30, 10 }
   0xf   : > { %293 = sbr.rel (%p290_p10) target bundleno = 1409 (0x581), region = 48  ;;  %1619 = vmatprep.subr.bf16.mxu0 (!%p290_p10), %v1717_v0  ;;  %v1720_v5 = vld [vmem:[%s2463_s1 + $0x18] sm:$0xff] (!%p290_p10)   ;;  %v1721_v6 = vld [vmem:[%s2463_s1 + $0x20] sm:$0xff] (!%p290_p10)   ;;  %v1722_v9 = vld [vmem:[%s2463_s1 + $0x28] sm:$0xff] (!%p290_p10)   ;;  %s2410_s21 = scalar_lea.hbm (!%p290_p10), %s2469_s7, %s1558_s16 }
  0x10   : > { %1620 = vmatpush3.bf16.msra.mxu0 (!%p290_p10), %v1717_v0  ;;  %v1723_v11 = vld [vmem:[%s2463_s1 + $0x30] sm:$0xff] (!%p290_p10)   ;;  %v1724_v13 = vld [vmem:[%s2463_s1 + $0x38] sm:$0xff] (!%p290_p10)   ;;  %v1505_v36 = vld [vmem:[%s2464_s2] ss:$0 sm:$0xff] (!%p290_p10) }
  0x11   : > { %1621 = vmatprep.subr.bf16.mxu0 (!%p290_p10), %v1718_v1  ;;  %v1725_v63 = vld [vmem:[%s2465_s3 + $0x4] ss:$8 sps:$4 sm:$0xff] (!%p290_p10)   ;;  %v1727_v0 = vld [vmem:[%s2465_s3] ss:$8 sps:$4 sm:$0xff] (!%p290_p10)  }
  0x12   : > { %664 = vmatprep.subr.bf16.mxu1 (!%p290_p10), %v1725_v63 }
  0x13   : > { %665 = vmatpush1.bf16.msra.mxu1 (!%p290_p10), %v1727_v0 }
  0x14   : > { %1622 = vmatpush3.bf16.msra.mxu0 (!%p290_p10), %v1718_v1 }
  0x15   : > { %1623 = vmatprep.subr.bf16.mxu0 (!%p290_p10), %v1719_v2 }
  0x16   : > { %s2013_s23 = scalar_select %p335_p11, %s1891_s30, 1 }
  0x18   : > { %s1556_s24 = sshll.u32 %s2013_s23, 7  ;;  %1624 = vmatpush3.bf16.msra.mxu0 %v1719_v2  ;;  %s1557_s20 = sshll.u32 %s2013_s23, 6 }
  0x19   : > { %s2022_s14 = scalar_lea.vmem %s2462_s0, %s1556_s24  ;;  %1625 = vmatprep.subr.bf16.mxu0 %v1720_v5  ;;  %s2376_s24 = scalar_lea.vmem %s2470_s8, %s1557_s20 }
  0x1a   : > { %v355_v3 = vld [vmem:[%s2022_s14] sm:$0xff]  ;;  %v356_v4 = vld [vmem:[%s2022_s14 + $0x8] sm:$0xff]  ;;  %v357_v7 = vld [vmem:[%s2022_s14 + $0x10] sm:$0xff]  ;;  %s321_s23 = sand.u32 1, %s1883_s28  }
  0x1b   : > { %371 = vxpose.xlu0.b32.start [1/16] (narrow) %v355_v3, 64  ;;  %v358_v8 = vld [vmem:[%s2022_s14 + $0x18] sm:$0xff]  ;;  %v359_v10 = vld [vmem:[%s2022_s14 + $0x20] sm:$0xff]  ;;  %v360_v12 = vld [vmem:[%s2022_s14 + $0x28] sm:$0xff]  ;;  %s1500_s25 = sshll.u32 %s321_s23, 6  ;;  %s2416_s30 = scalar_lea.sflag [#allocation3], %s321_s23 }
  0x1c   : > { %1626 = vmatpush3.bf16.msra.mxu0 %v1720_v5  ;;  %v361_v14 = vld [vmem:[%s2022_s14 + $0x30] sm:$0xff]  ;;  %v362_v15 = vld [vmem:[%s2022_s14 + $0x38] sm:$0xff]  ;;  %v363_v16 = vld [vmem:[%s2022_s14 + $0x40] sm:$0xff]  ;;  %s323_s12 = scalar_lea.vmem [#allocation2], %s1500_s25 }
  0x1d   : > { %1627 = vmatprep.subr.bf16.mxu0 %v1721_v6  ;;  %v364_v17 = vld [vmem:[%s2022_s14 + $0x48] sm:$0xff]  ;;  %v365_v18 = vld [vmem:[%s2022_s14 + $0x50] sm:$0xff]  ;;  %v366_v19 = vld [vmem:[%s2022_s14 + $0x58] sm:$0xff]  ;;  %s1375_s19 = sshll.u32 %s323_s12, 4  ;;  %s2412_s19 = int_to_ptr.vmem [resolvable:$true] %s1375_s19 }
  0x1e   : > { %v367_v20 = vld [vmem:[%s2022_s14 + $0x60] sm:$0xff]  ;;  %v368_v21 = vld [vmem:[%s2022_s14 + $0x68] sm:$0xff]  ;;  %v369_v22 = vld [vmem:[%s2022_s14 + $0x70] sm:$0xff]  ;;  %s1821_s22 = scalar_lea.vmem %s2412_s19, 1024 }
  0x1f   : > { %372 = vxpose.xlu0.b32.cont [2/16] (narrow) %v356_v4, 64  ;;  %v370_v23 = vld [vmem:[%s2022_s14 + $0x78] sm:$0xff]  ;;  %p1822_p12 = scmp.ne.s32.totalorder %s2412_s19, %s1821_s22 }
  0x20   : > { %1628 = vmatpush3.bf16.msra.mxu0 %v1721_v6  ;;  %v1728_v4 = vld [vmem:[%s2465_s3 + $0x14] ss:$8 sps:$4 sm:$0xff]   ;;  %v1730_v5 = vld [vmem:[%s2465_s3 + $0x10] ss:$8 sps:$4 sm:$0xff]  }
  0x21   : > { %1629 = vmatprep.subr.bf16.mxu0 %v1722_v9  ;;  %666 = vmatprep.subr.bf16.mxu1 %v1728_v4  ;;  %p1823_p13 = pnand %p1822_p12, %p1990_p4 }
  0x22   : > { %667 = vmatpush1.bf16.msra.mxu1 %v1730_v5 }
  0x23   : > { %373 = vxpose.xlu0.b32.cont [3/16] (narrow) %v357_v7, 64  ;;  %p1824_p0 = pneg %p1823_p13 }
  0x24   : > { %1630 = vmatpush3.bf16.msra.mxu0 %v1722_v9  ;;  %v1733_v9 = vld [vmem:[%s2465_s3 + $0x20] ss:$8 sps:$4 sm:$0xff]  }
  0x25   : > { %1631 = vmatprep.subr.bf16.mxu0 %v1723_v11 }
  0x27   : > { %374 = vxpose.xlu0.b32.cont [4/16] (narrow) %v358_v8, 64  ;;  %v1731_v8 = vld [vmem:[%s2465_s3 + $0x24] ss:$8 sps:$4 sm:$0xff]  }
  0x28   : > { %1632 = vmatpush3.bf16.msra.mxu0 %v1723_v11  ;;  %668 = vmatprep.subr.bf16.mxu1 %v1731_v8  ;;  %v1734_v11 = vld [vmem:[%s2465_s3 + $0x34] ss:$8 sps:$4 sm:$0xff]  }
  0x29   : > { %1633 = vmatprep.subr.bf16.mxu0 %v1724_v13  ;;  %669 = vmatpush1.bf16.msra.mxu1 %v1733_v9  ;;  %v1743_v9 = vld [vmem:[%s2466_s4 + $0x58] sm:$0xff]  }
  0x2a   : > { %670 = vmatprep.subr.bf16.mxu1 %v1734_v11  ;;  %v1744_v11 = vld [vmem:[%s2466_s4 + $0x18] sm:$0xff]  }
  0x2b   : > { %375 = vxpose.xlu0.b32.cont [5/16] (narrow) %v359_v10, 64 }
  0x2c   : > { %1634 = vmatpush3.bf16.msra.mxu0 %v1724_v13  ;;  %v1901_v13 = vmov 0  }
  0x2d   : > { %696 = vmatprep.mubr.bf16.mxu1 %v1901_v13 }
  0x2f   : > { %376 = vxpose.xlu0.b32.cont [6/16] (narrow) %v360_v12, 64  ;;  %v1736_v12 = vld [vmem:[%s2465_s3 + $0x30] ss:$8 sps:$4 sm:$0xff]  }
  0x30   : > { %671 = vmatpush1.bf16.msra.mxu1 %v1736_v12  ;;  %v1745_v12 = vld [vmem:[%s2466_s4 + $0x60] sm:$0xff]  }
  0x33   : > { %377 = vxpose.xlu0.b32.cont [7/16] (narrow) %v361_v14, 64 }
  0x37   : > { %378 = vxpose.xlu0.b32.cont [8/16] (narrow) %v362_v15, 64 }
  0x3b   : > { %379 = vxpose.xlu0.b32.cont [9/16] (narrow) %v363_v16, 64 }
  0x3f   : > { %380 = vxpose.xlu0.b32.cont [10/16] (narrow) %v364_v17, 64 }
  0x43   : > { %381 = vxpose.xlu0.b32.cont [11/16] (narrow) %v365_v18, 64 }
  0x47   : > { %382 = vxpose.xlu0.b32.cont [12/16] (narrow) %v366_v19, 64 }
  0x4b   : > { %383 = vxpose.xlu0.b32.cont [13/16] (narrow) %v367_v20, 64 }
  0x4f   : > { %384 = vxpose.xlu0.b32.cont [14/16] (narrow) %v368_v21, 64 }
  0x53   : > { %385 = vxpose.xlu0.b32.cont [15/16] (narrow) %v369_v22, 64 }
  0x57   : > { %386 = vxpose.xlu0.b32.end [16/16] (narrow) %v370_v23, 64 }
  0x9b   : > { %v387_v24 = vpop.trf.xlu0 }
  0x9f   : > { %v388_v25 = vpop.trf.xlu0 }
  0xa0   : > { %v403_v26 = vpack.c.bf16 %v388_v25, %v387_v24 }
  0xa2   : > { %1635 = vmatprep.mubr.bf16.mxu0 %v403_v26 }
  0xa3   : > { %v389_v27 = vpop.trf.xlu0 }
  0xa7   : > { %v390_v28 = vpop.trf.xlu0 }
  0xa8   : > { %v404_v29 = vpack.c.bf16 %v390_v28, %v389_v27 }
  0xaa   : > { %1636 = vmatmul.mubr.bf16.vlgmr.msra.gmra.mrb[0].mxu0 %v404_v29 }
  0xab   : > { %v391_v30 = vpop.trf.xlu0 }
  0xaf   : > { %v392_v31 = vpop.trf.xlu0 }
  0xb0   : > { %v405_v32 = vpack.c.bf16 %v392_v31, %v391_v30 }
  0xb2   : > { %1639 = vmatprep.mubr.bf16.mxu0 %v405_v32 }
  0xb3   : > { %v393_v33 = vpop.trf.xlu0 }
  0xb7   : > { %v394_v34 = vpop.trf.xlu0 }
  0xb8   : > { %v406_v35 = vpack.c.bf16 %v394_v34, %v393_v33 }
  0xba   : > { %1640 = vmatmul.mubr.bf16.gmra.mrb[4].mxu0 %v406_v35 }
 0x17d   : > { %v1637_v37 = vpop.f32.mrb[0].mxu0 }
 0x17e   : > { %v512_v38 = vpop.f32.mrb[1].mxu0  ;;  %v2064_v44 = vadd.f32 %v1637_v37, %v1505_v36 }
 0x17f   : > { %v2058_v39 = vadd.f32 %v1505_v36, %v512_v38  ;;  %v1638_v40 = vpop.f32.mrb[2].mxu0 }
 0x180   : > { %v515_v41 = vpop.f32.mrb[3].mxu0  ;;  %v2069_v47 = vadd.f32 %v1638_v40, %v1505_v36  ;;  %v545_v49 = vmul.f32 %v2064_v44, %v2064_v44 }
 0x181   : > { %v2060_v42 = vadd.f32 %v1505_v36, %v515_v41  ;;  %v543_v43 = vmul.f32 %v2058_v39, %v2058_v39 }
 0x182   : > { %v558_v50 = vsel %vm551_vm0, %v545_v49, 0.0  ;;  %v546_v51 = vmul.f32 %v2069_v47, %v2069_v47 }
 0x183   : > { %v552_v45 = vsel %vm551_vm0, %v543_v43, 0.0  ;;  %v544_v46 = vmul.f32 %v2060_v42, %v2060_v42 }
 0x184   : > { %553 = vadd.xlane.f32.xlu1 %v552_v45  ;;  %v561_v56 = vsel %vm551_vm0, %v546_v51, 0.0  ;;  %v1738_v51 = vld [vmem:[%s2466_s4] sm:$0xff]  }
 0x185   : > { %v555_v48 = vsel %vm551_vm0, %v544_v46, 0.0 }
 0x188   : > { %556 = vadd.xlane.f32.xlu1 %v555_v48 }
 0x18c   : > { %559 = vadd.xlane.f32.xlu1 %v558_v50  ;;  %v1737_v50 = vld [vmem:[%s2466_s4 + $0x40] sm:$0xff]  }
 0x18d   : > { %v1641_v52 = vpop.f32.mrb[4].mxu0  ;;  %1571 = vmatprep.subr.bf16.mxu1 %v1737_v50 }
 0x18e   : > { %v528_v53 = vpop.f32.mrb[5].mxu0  ;;  %v2084_v60 = vadd.f32 %v1641_v52, %v1505_v36  ;;  %v1739_v52 = vld [vmem:[%s2466_s4 + $0x48] sm:$0xff]  }
 0x18f   : > { %v2077_v54 = vadd.f32 %v1505_v36, %v528_v53  ;;  %v1642_v55 = vpop.f32.mrb[6].mxu0  ;;  %v1740_v53 = vld [vmem:[%s2466_s4 + $0x8] sm:$0xff]  }
 0x190   : > { %562 = vadd.xlane.f32.xlu1 %v561_v56  ;;  %v531_v57 = vpop.f32.mrb[7].mxu0  ;;  %v2095_v1 = vadd.f32 %v1642_v55, %v1505_v36  ;;  %v549_v3 = vmul.f32 %v2084_v60, %v2084_v60  ;;  %v1742_v55 = vld [vmem:[%s2466_s4 + $0x10] sm:$0xff]  }
 0x191   : > { %v2080_v58 = vadd.f32 %v1505_v36, %v531_v57  ;;  %v547_v59 = vmul.f32 %v2077_v54, %v2077_v54 }
 0x192   : > { %v570_v6 = vsel %vm551_vm0, %v549_v3, 0.0  ;;  %v550_v7 = vmul.f32 %v2095_v1, %v2095_v1 }
 0x193   : > { %v564_v61 = vsel %vm551_vm0, %v547_v59, 0.0  ;;  %v548_v62 = vmul.f32 %v2080_v58, %v2080_v58 }
 0x194   : > { %565 = vadd.xlane.f32.xlu1 %v564_v61  ;;  %v573_v10 = vsel %vm551_vm0, %v550_v7, 0.0 }
 0x195   : > { %v567_v2 = vsel %vm551_vm0, %v548_v62, 0.0 }
 0x198   : > { %568 = vadd.xlane.f32.xlu1 %v567_v2 }
 0x19c   : > { %571 = vadd.xlane.f32.xlu1 %v570_v6 }
 0x1a0   : > { %574 = vadd.xlane.f32.xlu1 %v573_v10 }
 0x211   : > { %v554_v14 = vpop.xlane.xlu1 %553 }
 0x212   : > { %v576_v15 = vmax.f32 %v554_v14, 1e-30  ;;  %v1746_v14 = vld [vmem:[%s2466_s4 + $0x20] sm:$0xff]  }
 0x214   : > { %1757 = vrsqrt.f32 %v576_v15 }
 0x215   : > { %v557_v16 = vpop.xlane.xlu1 %556 }
 0x216   : > { %v577_v17 = vmax.f32 %v557_v16, 1e-30 }
 0x218   : > { %1759 = vrsqrt.f32 %v577_v17 }
 0x219   : > { %v560_v18 = vpop.xlane.xlu1 %559 }
 0x21a   : > { %v578_v19 = vmax.f32 %v560_v18, 1e-30 }
 0x21c   : > { %1761 = vrsqrt.f32 %v578_v19  ;;  %v1747_v19 = vld [vmem:[%s2466_s4 + $0x68] sm:$0xff]  }
 0x21d   : > { %v563_v20 = vpop.xlane.xlu1 %562 }
 0x21e   : > { %v579_v21 = vmax.f32 %v563_v20, 1e-30  ;;  %v1758_v22 = vpop.eup %1757 }
 0x21f   : > { %v592_v26 = vmul.f32 %v1758_v22, %v2058_v39  ;;  %v1749_v22 = vld [vmem:[%s2466_s4 + $0x70] sm:$0xff]  }
 0x220   : > { %1763 = vrsqrt.f32 %v579_v21  ;;  %v1748_v21 = vld [vmem:[%s2466_s4 + $0x28] sm:$0xff]  }
 0x221   : > { %v566_v23 = vpop.xlane.xlu1 %565 }
 0x222   : > { %v1760_v24 = vpop.eup %1759  ;;  %v580_v25 = vmax.f32 %v566_v23, 1e-30  ;;  %v1750_v23 = vld [vmem:[%s2466_s4 + $0x30] sm:$0xff]  }
 0x223   : > { %v593_v27 = vmul.f32 %v1760_v24, %v2060_v42  ;;  %v1751_v24 = vld [vmem:[%s2466_s4 + $0x78] sm:$0xff]  }
 0x224   : > { %1765 = vrsqrt.f32 %v580_v25  ;;  %v1752_v25 = vld [vmem:[%s2466_s4 + $0x38] sm:$0xff]  }
 0x225   : > { %v569_v28 = vpop.xlane.xlu1 %568  ;;  %v600_v29 = vpack.c.bf16 %v593_v27, %v592_v26  ;;  %v833_v26 = vlaneseq }
 0x226   : > { %v581_v30 = vmax.f32 %v569_v28, 1e-30  ;;  %v1762_v31 = vpop.eup %1761 }
 0x227   : > { %1522 = vmatmul.mubr.msk.bf16.vlgmr.msra.gmra.mrb[0].mxu1 %vm551_vm0, %v600_v29  ;;  %v594_v35 = vmul.f32 %v1762_v31, %v2064_v44  ;;  %v2224_v27 = vand.u32 127, %v833_v26 }
 0x228   : > { %1767 = vrsqrt.f32 %v581_v30  ;;  %706 = vmatprep.mubr.bf16.mxu1 %v1901_v13  ;;  %1572 = vmatpush3.bf16.msra.mxu1 %v1738_v51 }
 0x229   : > { %v572_v32 = vpop.xlane.xlu1 %571  ;;  %1573 = vmatprep.subr.bf16.mxu1 %v1739_v52  ;;  %v2227_v28 = vadd.s32 128, %v2224_v27 }
 0x22a   : > { %v1764_v33 = vpop.eup %1763  ;;  %v582_v34 = vmax.f32 %v572_v32, 1e-30 }
 0x22b   : > { %v595_v36 = vmul.f32 %v1764_v33, %v2069_v47 }
 0x22c   : > { %1769 = vrsqrt.f32 %v582_v34  ;;  %1574 = vmatpush3.bf16.msra.mxu1 %v1740_v53 }
 0x22d   : > { %v575_v37 = vpop.xlane.xlu1 %574  ;;  %v601_v38 = vpack.c.bf16 %v595_v36, %v594_v35 }
 0x22e   : > { %v583_v39 = vmax.f32 %v575_v37, 1e-30  ;;  %v1766_v40 = vpop.eup %1765 }
 0x22f   : > { %1523 = vmatmul.mubr.msk.bf16.gmra.mrb[4].mxu1 %vm551_vm0, %v601_v38  ;;  %v596_v42 = vmul.f32 %v1766_v40, %v2077_v54  ;;  %v1741_v54 = vld [vmem:[%s2466_s4 + $0x50] sm:$0xff]  }
 0x230   : > { %1771 = vrsqrt.f32 %v583_v39  ;;  %716 = vmatprep.mubr.bf16.mxu1 %v1901_v13  ;;  %1575 = vmatprep.subr.bf16.mxu1 %v1741_v54 }
 0x231   : > { %1576 = vmatpush3.bf16.msra.mxu1 %v1742_v55 }
 0x232   : > { %v1768_v41 = vpop.eup %1767  ;;  %1577 = vmatprep.subr.bf16.mxu1 %v1743_v9 }
 0x233   : > { %v597_v43 = vmul.f32 %v1768_v41, %v2080_v58 }
 0x235   : > { %v602_v45 = vpack.c.bf16 %v597_v43, %v596_v42  ;;  %1578 = vmatpush3.bf16.msra.mxu1 %v1744_v11 }
 0x236   : > { %v1770_v44 = vpop.eup %1769  ;;  %1579 = vmatprep.subr.bf16.mxu1 %v1745_v12 }
 0x237   : > { %1524 = vmatmul.mubr.msk.bf16.gmra.mrb[8].mxu1 %vm551_vm0, %v602_v45  ;;  %v598_v47 = vmul.f32 %v1770_v44, %v2084_v60 }
 0x238   : > { %726 = vmatprep.mubr.bf16.mxu1 %v1901_v13 }
 0x239   : > { %1580 = vmatpush3.bf16.msra.mxu1 %v1746_v14 }
 0x23a   : > { %v1772_v46 = vpop.eup %1771  ;;  %1581 = vmatprep.subr.bf16.mxu1 %v1747_v19 }
 0x23b   : > { %v599_v48 = vmul.f32 %v1772_v46, %v2095_v1 }
 0x23d   : > { %v603_v49 = vpack.c.bf16 %v599_v48, %v598_v47  ;;  %1582 = vmatpush3.bf16.msra.mxu1 %v1748_v21 }
 0x23e   : > { %1583 = vmatprep.subr.bf16.mxu1 %v1749_v22 }
 0x23f   : > { %1525 = vmatmul.mubr.msk.bf16.gmra.mrb[12].mxu1 %vm551_vm0, %v603_v49 }
 0x241   : > { %1584 = vmatpush3.bf16.msra.mxu1 %v1750_v23 }
 0x242   : > { %1585 = vmatprep.subr.bf16.mxu1 %v1751_v24 }
 0x245   : > { %1586 = vmatpush3.bf16.msra.mxu1 %v1752_v25 }
 0x2fa   : > { %v698_v56 = vpop.f32.mrb[0].mxu1 }
 0x2fb   : > { %v700_v57 = vpop.f32.mrb[1].mxu1 }
 0x2fc   : > { %v2152_v58 = vpop.f32.mrb[2].mxu1  ;;  %v737_v59 = vmax.f32 %v698_v56, %v700_v57 }
 0x2fd   : > { %v2154_v60 = vpop.f32.mrb[3].mxu1 }
 0x2fe   : > { %738 = vmax.xlane.f32.xlu1 %v737_v59  ;;  %v740_v61 = vmax.f32 %v2152_v58, %v2154_v60 }
 0x302   : > { %v2158_v62 = vpop.f32.mrb[4].mxu1  ;;  %741 = vmax.xlane.f32.xlu1 %v740_v61 }
 0x303   : > { %v2160_v63 = vpop.f32.mrb[5].mxu1 }
 0x304   : > { %v2162_v0 = vpop.f32.mrb[6].mxu1  ;;  %v743_v1 = vmax.f32 %v2158_v62, %v2160_v63 }
 0x305   : > { %v2166_v2 = vpop.f32.mrb[7].mxu1 }
 0x306   : > { %744 = vmax.xlane.f32.xlu1 %v743_v1  ;;  %v746_v3 = vmax.f32 %v2162_v0, %v2166_v2 }
 0x30a   : > { %747 = vmax.xlane.f32.xlu1 %v746_v3  ;;  %v2170_v4 = vpop.f32.mrb[8].mxu1 }
 0x30b   : > { %v2172_v5 = vpop.f32.mrb[9].mxu1 }
 0x30c   : > { %v2174_v6 = vpop.f32.mrb[10].mxu1  ;;  %v749_v7 = vmax.f32 %v2170_v4, %v2172_v5 }
 0x30d   : > { %v2178_v8 = vpop.f32.mrb[11].mxu1 }
 0x30e   : > { %750 = vmax.xlane.f32.xlu1 %v749_v7  ;;  %v752_v10 = vmax.f32 %v2174_v6, %v2178_v8 }
 0x312   : > { %753 = vmax.xlane.f32.xlu1 %v752_v10  ;;  %v2191_v13 = vpop.f32.mrb[12].mxu1 }
 0x313   : > { %v2196_v15 = vpop.f32.mrb[13].mxu1 }
 0x314   : > { %v2198_v16 = vpop.f32.mrb[14].mxu1  ;;  %v755_v17 = vmax.f32 %v2191_v13, %v2196_v15 }
 0x315   : > { %v2202_v18 = vpop.f32.mrb[15].mxu1 }
 0x316   : > { %756 = vmax.xlane.f32.xlu1 %v755_v17  ;;  %v758_v20 = vmax.f32 %v2198_v16, %v2202_v18 }
 0x31a   : > { %759 = vmax.xlane.f32.xlu1 %v758_v20 }
 0x38b   : > { %v739_v29 = vpop.xlane.xlu1 %738 }
 0x38c   : > { %v761_v30 = vsub.f32 %v698_v56, %v739_v29  ;;  %v762_v31 = vsub.f32 %v700_v57, %v739_v29  ;;  %vm836_vm1 = vcmp.eq.f32.partialorder %v698_v56, %v739_v29  ;;  %vm837_vm2 = vcmp.eq.f32.partialorder %v700_v57, %v739_v29 }
 0x38d   : > { %v852_v32 = vsel %vm836_vm1, %v2224_v27, 256  ;;  %v853_v33 = vsel %vm837_vm2, %v2227_v28, 256 }
 0x38e   : > { %v777_v34 = vmul.f32 1.442695, %v761_v30  ;;  %v779_v35 = vmul.f32 1.442695, %v762_v31  ;;  %vm868_vm3 = vcmp.lt.s32.totalorder %v852_v32, %v853_v33 }
 0x38f   : > { %v742_v36 = vpop.xlane.xlu1 %741  ;;  %v2231_v37 = vsel %vm868_vm3, %v852_v32, %v853_v33 }
 0x390   : > { %1773 = vpow2.f32 %v777_v34  ;;  %v763_v38 = vsub.f32 %v2152_v58, %v742_v36  ;;  %v764_v39 = vsub.f32 %v2154_v60, %v742_v36  ;;  %vm838_vm4 = vcmp.eq.f32.partialorder %v2152_v58, %v742_v36 }
 0x391   : > { %1775 = vpow2.f32 %v779_v35  ;;  %vm839_vm5 = vcmp.eq.f32.partialorder %v2154_v60, %v742_v36  ;;  %v854_v40 = vsel %vm838_vm4, %v2224_v27, 256 }
 0x392   : > { %v781_v41 = vmul.f32 1.442695, %v763_v38  ;;  %v783_v42 = vmul.f32 1.442695, %v764_v39  ;;  %v855_v43 = vsel %vm839_vm5, %v2227_v28, 256 }
 0x393   : > { %v745_v45 = vpop.xlane.xlu1 %744  ;;  %vm884_vm6 = vcmp.lt.s32.totalorder %v854_v40, %v855_v43 }
 0x394   : > { %1777 = vpow2.f32 %v781_v41  ;;  %v765_v44 = vsub.f32 %v2158_v62, %v745_v45  ;;  %v766_v46 = vsub.f32 %v2160_v63, %v745_v45  ;;  %vm840_vm7 = vcmp.eq.f32.partialorder %v2158_v62, %v745_v45 }
 0x395   : > { %1779 = vpow2.f32 %v783_v42  ;;  %vm841_vm8 = vcmp.eq.f32.partialorder %v2160_v63, %v745_v45  ;;  %v2243_v47 = vsel %vm884_vm6, %v854_v40, %v855_v43  ;;  %v856_v48 = vsel %vm840_vm7, %v2224_v27, 256 }
 0x396   : > { %v785_v49 = vmul.f32 1.442695, %v765_v44  ;;  %v787_v50 = vmul.f32 1.442695, %v766_v46  ;;  %v857_v51 = vsel %vm841_vm8, %v2227_v28, 256 }
 0x397   : > { %v748_v52 = vpop.xlane.xlu1 %747  ;;  %vm900_vm9 = vcmp.lt.s32.totalorder %v856_v48, %v857_v51 }
 0x398   : > { %1781 = vpow2.f32 %v785_v49  ;;  %v767_v53 = vsub.f32 %v2162_v0, %v748_v52  ;;  %v768_v54 = vsub.f32 %v2166_v2, %v748_v52  ;;  %vm842_vm10 = vcmp.eq.f32.partialorder %v2162_v0, %v748_v52 }
 0x399   : > { %1783 = vpow2.f32 %v787_v50  ;;  %vm843_vm11 = vcmp.eq.f32.partialorder %v2166_v2, %v748_v52  ;;  %v2251_v55 = vsel %vm900_vm9, %v856_v48, %v857_v51  ;;  %v858_v61 = vsel %vm842_vm10, %v2224_v27, 256 }
 0x39a   : > { %v1774_v56 = vpop.eup %1773  ;;  %v789_v57 = vmul.f32 1.442695, %v767_v53  ;;  %v791_v58 = vmul.f32 1.442695, %v768_v54  ;;  %v859_v62 = vsel %vm843_vm11, %v2227_v28, 256 }
 0x39b   : > { %v1776_v59 = vpop.eup %1775  ;;  %v751_v60 = vpop.xlane.xlu1 %750  ;;  %vm916_vm14 = vcmp.lt.s32.totalorder %v858_v61, %v859_v62 }
 0x39c   : > { %1785 = vpow2.f32 %v789_v57  ;;  %v769_v63 = vsub.f32 %v2170_v4, %v751_v60  ;;  %v770_v1 = vsub.f32 %v2172_v5, %v751_v60  ;;  %vm844_vm12 = vcmp.eq.f32.partialorder %v2170_v4, %v751_v60 }
 0x39d   : > { %1787 = vpow2.f32 %v791_v58  ;;  %vm845_vm13 = vcmp.eq.f32.partialorder %v2172_v5, %v751_v60  ;;  %v809_v0 = vadd.f32 %v1776_v59, %v1774_v56  ;;  %v2259_v12 = vsel %vm916_vm14, %v858_v61, %v859_v62 }
 0x39e   : > { %v1778_v2 = vpop.eup %1777  ;;  %v793_v3 = vmul.f32 1.442695, %v769_v63  ;;  %v795_v7 = vmul.f32 1.442695, %v770_v1  ;;  %v860_v14 = vsel %vm844_vm12, %v2224_v27, 256  ;;  %v861_v17 = vsel %vm845_vm13, %v2227_v28, 256 }
 0x39f   : > { %v1780_v9 = vpop.eup %1779  ;;  %810 = vadd.xlane.f32.xlu0 %v809_v0  ;;  %v754_v10 = vpop.xlane.xlu1 %753  ;;  %v1005_v11 = vpack.c.bf16 %v1778_v2, %v1774_v56  ;;  %vm932_vm3 = vcmp.lt.s32.totalorder %v860_v14, %v861_v17 }
 0x3a0   : > { %1789 = vpow2.f32 %v793_v3  ;;  %v771_v4 = vsub.f32 %v2174_v6, %v754_v10  ;;  %v772_v5 = vsub.f32 %v2178_v8, %v754_v10  ;;  %vm846_vm15 = vcmp.eq.f32.partialorder %v2174_v6, %v754_v10 }
 0x3a1   : > { %1791 = vpow2.f32 %v795_v7  ;;  %vm847_vm1 = vcmp.eq.f32.partialorder %v2178_v8, %v754_v10  ;;  %v1006_v19 = vpack.c.bf16 %v1780_v9, %v1776_v59  ;;  %v812_v20 = vadd.f32 %v1780_v9, %v1778_v2 }
 0x3a2   : > { %v1782_v21 = vpop.eup %1781  ;;  %v797_v22 = vmul.f32 1.442695, %v771_v4  ;;  %v799_v23 = vmul.f32 1.442695, %v772_v5  ;;  %v862_v24 = vsel %vm846_vm15, %v2224_v27, 256  ;;  %v863_v25 = vsel %vm847_vm1, %v2227_v28, 256 }
 0x3a3   : > { %v1784_v26 = vpop.eup %1783  ;;  %1173 = vmatprep.mubr.bf16.mxu1 %v1006_v19  ;;  %813 = vadd.xlane.f32.xlu1 %v812_v20  ;;  %v757_v29 = vpop.xlane.xlu1 %756  ;;  %vm948_vm2 = vcmp.lt.s32.totalorder %v862_v24, %v863_v25  ;;  %v2277_v40 = vsel %vm932_vm3, %v860_v14, %v861_v17  ;;  %v871_v7 = vshra.s32 %v2231_v37, 16  ;;  %v887_v10 = vshra.s32 %v2243_v47, 16 }
 0x3a4   : > { %1793 = vpow2.f32 %v797_v22  ;;  %1174 = vmatmul.mubr.bf16.vlgmr.msra.gmra.mrb[16].mxu1 %v1005_v11  ;;  %v773_v6 = vsub.f32 %v2191_v13, %v757_v29  ;;  %v774_v8 = vsub.f32 %v2196_v15, %v757_v29  ;;  %vm848_vm4 = vcmp.eq.f32.partialorder %v2191_v13, %v757_v29 }
 0x3a5   : > { %1795 = vpow2.f32 %v799_v23  ;;  %vm849_vm5 = vcmp.eq.f32.partialorder %v2196_v15, %v757_v29  ;;  %v815_v30 = vadd.f32 %v1784_v26, %v1782_v21  ;;  %v2273_v31 = vsel %vm948_vm2, %v862_v24, %v863_v25  ;;  %v1753_v23 = vld [vmem:[%s2467_s5] sm:$0xff]   ;;  %v1754_v24 = vld [vmem:[%s2467_s5 + $0x8] sm:$0xff]   ;;  %v1755_v25 = vld [vmem:[%s2467_s5 + $0x10] sm:$0xff]  }
 0x3a6   : > { %v1786_v32 = vpop.eup %1785  ;;  %v801_v33 = vmul.f32 1.442695, %v773_v6  ;;  %v803_v34 = vmul.f32 1.442695, %v774_v8  ;;  %v951_v35 = vshra.s32 %v2273_v31, 16  ;;  %v864_v13 = vsel %vm848_vm4, %v2224_v27, 256  ;;  %1643 = vmatprep.subr.bf16.mxu0 %v1753_v23 }
 0x3a7   : > { %v1788_v36 = vpop.eup %1787  ;;  %816 = vadd.xlane.f32.xlu1 %v815_v30  ;;  %v760_v38 = vpop.xlane.xlu1 %759  ;;  %v1007_v39 = vpack.c.bf16 %v1786_v32, %v1782_v21  ;;  %v865_v41 = vsel %vm849_vm5, %v2227_v28, 256  ;;  %v873_v9 = vcvt.s32.f32 %v871_v7  ;;  %v889_v11 = vcvt.s32.f32 %v887_v10  ;;  %1644 = vmatpush3.bf16.msra.mxu0 %v1753_v23 }
 0x3a8   : > { %1797 = vpow2.f32 %v801_v33  ;;  %v775_v15 = vsub.f32 %v2198_v16, %v760_v38  ;;  %v776_v42 = vsub.f32 %v2202_v18, %v760_v38  ;;  %vm850_vm6 = vcmp.eq.f32.partialorder %v2198_v16, %v760_v38  ;;  %1645 = vmatprep.subr.bf16.mxu0 %v1754_v24 }
 0x3a9   : > { %1799 = vpow2.f32 %v803_v34  ;;  %vm851_vm7 = vcmp.eq.f32.partialorder %v2202_v18, %v760_v38  ;;  %v2285_v43 = vcvt.s32.f32 %v951_v35  ;;  %v1008_v45 = vpack.c.bf16 %v1788_v36, %v1784_v26  ;;  %v1756_v26 = vld [vmem:[%s2467_s5 + $0x18] sm:$0xff]  }
 0x3aa   : > { %v1790_v44 = vpop.eup %1789  ;;  %v805_v46 = vmul.f32 1.442695, %v775_v15  ;;  %v807_v48 = vmul.f32 1.442695, %v776_v42  ;;  %v818_v49 = vadd.f32 %v1788_v36, %v1786_v32  ;;  %v866_v50 = vsel %vm850_vm6, %v2224_v27, 256 }
 0x3ab   : > { %v1792_v51 = vpop.eup %1791  ;;  %954 = vmin.xlane.f32.xlu0 %v2285_v43  ;;  %1181 = vmatprep.mubr.bf16.mxu1 %v1008_v45  ;;  %v867_v52 = vsel %vm851_vm7, %v2227_v28, 256  ;;  %vm964_vm8 = vcmp.lt.s32.totalorder %v864_v13, %v865_v41  ;;  %v903_v14 = vshra.s32 %v2251_v55, 16  ;;  %v919_v4 = vshra.s32 %v2259_v12, 16 }
 0x3ac   : > { %1801 = vpow2.f32 %v805_v46  ;;  %819 = vadd.xlane.f32.xlu1 %v818_v49  ;;  %1182 = vmatmul.mubr.bf16.gmra.mrb[20].mxu1 %v1007_v39  ;;  %v821_v16 = vadd.f32 %v1792_v51, %v1790_v44  ;;  %vm980_vm9 = vcmp.lt.s32.totalorder %v866_v50, %v867_v52  ;;  %v2290_v18 = vsel %vm964_vm8, %v864_v13, %v865_v41 }
 0x3ad   : > { %1803 = vpow2.f32 %v807_v48  ;;  %v2292_v53 = vsel %vm980_vm9, %v866_v50, %v867_v52  ;;  %v905_v17 = vcvt.s32.f32 %v903_v14  ;;  %v921_v5 = vcvt.s32.f32 %v919_v4  ;;  %1646 = vmatpush3.bf16.msra.mxu0 %v1754_v24 }
 0x3ae   : > { %v1794_v54 = vpop.eup %1793  ;;  %v983_v27 = vshra.s32 %v2292_v53, 16  ;;  %v935_v19 = vshra.s32 %v2277_v40, 16  ;;  %v967_v21 = vshra.s32 %v2290_v18, 16  ;;  %1647 = vmatprep.subr.bf16.mxu0 %v1755_v25  ;;  %v870_v35 = vand.u32 65535, %v2231_v37 }
 0x3af   : > { %v1796_v56 = vpop.eup %1795  ;;  %v1009_v57 = vpack.c.bf16 %v1794_v54, %v1790_v44  ;;  %v886_v39 = vand.u32 65535, %v2243_v47  ;;  %v902_v42 = vand.u32 65535, %v2251_v55  ;;  %v918_v48 = vand.u32 65535, %v2259_v12 }
 0x3b0   : > { %822 = vadd.xlane.f32.xlu1 %v821_v16  ;;  %v2295_v58 = vcvt.s32.f32 %v983_v27  ;;  %v1010_v28 = vpack.c.bf16 %v1796_v56, %v1792_v51  ;;  %v824_v59 = vadd.f32 %v1796_v56, %v1794_v54  ;;  %v937_v20 = vcvt.s32.f32 %v935_v19 }
 0x3b1   : > { %v2304_v22 = vcvt.s32.f32 %v967_v21  ;;  %1648 = vmatpush3.bf16.msra.mxu0 %v1755_v25  ;;  %v872_v38 = vcvt.s32.f32 %v870_v35  ;;  %v888_v15 = vcvt.s32.f32 %v886_v39  ;;  %v904_v46 = vcvt.s32.f32 %v902_v42 }
 0x3b2   : > { %v1798_v60 = vpop.eup %1797  ;;  %986 = vmin.xlane.f32.xlu0 %v2295_v58  ;;  %1189 = vmatprep.mubr.bf16.mxu1 %v1010_v28  ;;  %v920_v51 = vcvt.s32.f32 %v918_v48  ;;  %v950_v55 = vand.u32 65535, %v2273_v31  ;;  %v934_v52 = vand.u32 65535, %v2277_v40  ;;  %v966_v28 = vand.u32 65535, %v2290_v18 }
 0x3b3   : > { %v1800_v61 = vpop.eup %1799  ;;  %1649 = vmatprep.subr.bf16.mxu0 %v1756_v26  ;;  %vm996_vm3 = vcmask 7168  }
 0x3b4   : > { %825 = vadd.xlane.f32.xlu1 %v824_v59  ;;  %1190 = vmatmul.mubr.bf16.gmra.mrb[24].mxu1 %v1009_v57  ;;  %v827_v62 = vadd.f32 %v1800_v61, %v1798_v60  ;;  %v952_v27 = vcvt.s32.f32 %v950_v55  ;;  %v936_v56 = vcvt.s32.f32 %v934_v52  ;;  %v982_v57 = vand.u32 65535, %v2292_v53 }
 0x3b5   : > { %1650 = vmatpush3.bf16.msra.mxu0 %v1756_v26 }
 0x3b6   : > { %v1802_v63 = vpop.eup %1801  ;;  %v984_v59 = vcvt.s32.f32 %v982_v57 }
 0x3b7   : > { %v1804_v1 = vpop.eup %1803  ;;  %v1011_v0 = vpack.c.bf16 %v1802_v63, %v1798_v60  ;;  %v968_v60 = vcvt.s32.f32 %v966_v28 }
 0x3b8   : > { %828 = vadd.xlane.f32.xlu1 %v827_v62  ;;  %v1012_v2 = vpack.c.bf16 %v1804_v1, %v1800_v61  ;;  %v830_v3 = vadd.f32 %v1804_v1, %v1802_v63 }
 0x3ba   : > { %1197 = vmatprep.mubr.bf16.mxu1 %v1012_v2 }
 0x3bc   : > { %831 = vadd.xlane.f32.xlu1 %v830_v3  ;;  %1198 = vmatmul.mubr.bf16.gmra.mrb[28].mxu1 %v1011_v0 }
 0x3c0   : > { %874 = vmin.xlane.f32.xlu1 %v873_v9 }
 0x3c4   : > { %890 = vmin.xlane.f32.xlu1 %v889_v11 }
 0x3c8   : > { %906 = vmin.xlane.f32.xlu1 %v905_v17 }
 0x3cc   : > { %922 = vmin.xlane.f32.xlu1 %v921_v5 }
 0x3d0   : > { %938 = vmin.xlane.f32.xlu1 %v937_v20 }
 0x3d4   : > { %970 = vmin.xlane.f32.xlu1 %v2304_v22 }
 0x42c   : > { %v811_v44 = vpop.xlane.xlu0 %810 }
 0x42d   : > { %1805 = vrcp.f32 %v811_v44 }
 0x430   : > { %v814_v29 = vpop.xlane.xlu1 %813 }
 0x431   : > { %1807 = vrcp.f32 %v814_v29 }
 0x434   : > { %v817_v6 = vpop.xlane.xlu1 %816 }
 0x435   : > { %1809 = vrcp.f32 %v817_v6 }
 0x437   : > { %v1806_v0 = vpop.eup %1805 }
 0x438   : > { %v2340_v49 = vpop.xlane.xlu0 %954 }
 0x439   : > { %v820_v8 = vpop.xlane.xlu1 %819  ;;  %vm956_vm14 = vcmp.eq.f32.partialorder %v2285_v43, %v2340_v49 }
 0x43a   : > { %v957_v31 = vsel %vm956_vm14, %v952_v27, inf  ;;  %1811 = vrcp.f32 %v820_v8 }
 0x43b   : > { %v1808_v3 = vpop.eup %1807 }
 0x43d   : > { %v2319_v30 = vpop.xlane.xlu1 %822 }
 0x43e   : > { %1813 = vrcp.f32 %v2319_v30 }
 0x43f   : > { %v2349_v12 = vpop.xlane.xlu0 %986 }
 0x440   : > { %vm988_vm1 = vcmp.eq.f32.partialorder %v2295_v58, %v2349_v12 }
 0x441   : > { %v2321_v32 = vpop.xlane.xlu1 %825  ;;  %v989_v61 = vsel %vm988_vm1, %v984_v59, inf }
 0x442   : > { %1815 = vrcp.f32 %v2321_v32 }
 0x445   : > { %v2323_v33 = vpop.xlane.xlu1 %828 }
 0x446   : > { %1817 = vrcp.f32 %v2323_v33 }
 0x449   : > { %v2325_v34 = vpop.xlane.xlu1 %831 }
 0x44a   : > { %1819 = vrcp.f32 %v2325_v34 }
 0x44d   : > { %v2328_v36 = vpop.xlane.xlu1 %874 }
 0x44e   : > { %vm876_vm10 = vcmp.eq.f32.partialorder %v873_v9, %v2328_v36  ;;  %v881_v52 = vcvt.f32.s32 %v2328_v36 }
 0x44f   : > { %v877_v13 = vsel %vm876_vm10, %v872_v38, inf }
 0x450   : > { %878 = vmin.xlane.f32.xlu1 %v877_v13  ;;  %v882_v27 = vshll.u32 %v881_v52, 16 }
 0x451   : > { %v2332_v41 = vpop.xlane.xlu1 %890 }
 0x452   : > { %vm892_vm11 = vcmp.eq.f32.partialorder %v889_v11, %v2332_v41 }
 0x453   : > { %v893_v45 = vsel %vm892_vm11, %v888_v15, inf }
 0x454   : > { %894 = vmin.xlane.f32.xlu0 %v893_v45 }
 0x455   : > { %v2336_v37 = vpop.xlane.xlu1 %906 }
 0x456   : > { %vm908_vm12 = vcmp.eq.f32.partialorder %v905_v17, %v2336_v37  ;;  %v913_v36 = vcvt.f32.s32 %v2336_v37 }
 0x457   : > { %v909_v47 = vsel %vm908_vm12, %v904_v46, inf }
 0x458   : > { %910 = vmin.xlane.f32.xlu1 %v909_v47 }
 0x459   : > { %v2342_v50 = vpop.xlane.xlu1 %922 }
 0x45a   : > { %vm924_vm13 = vcmp.eq.f32.partialorder %v921_v5, %v2342_v50  ;;  %v1810_v5 = vpop.eup %1809 }
 0x45b   : > { %v925_v16 = vsel %vm924_vm13, %v920_v51, inf }
 0x45c   : > { %926 = vmin.xlane.f32.xlu0 %v925_v16 }
 0x45d   : > { %v2351_v54 = vpop.xlane.xlu1 %938 }
 0x45e   : > { %vm940_vm15 = vcmp.eq.f32.partialorder %v937_v20, %v2351_v54 }
 0x45f   : > { %v941_v40 = vsel %vm940_vm15, %v936_v56, inf  ;;  %v897_v56 = vcvt.f32.s32 %v2332_v41 }
 0x460   : > { %958 = vmin.xlane.f32.xlu0 %v957_v31  ;;  %942 = vmin.xlane.f32.xlu1 %v941_v40 }
 0x461   : > { %v2358_v43 = vpop.xlane.xlu1 %970  ;;  %v898_v40 = vshll.u32 %v897_v56, 16 }
 0x462   : > { %vm972_vm2 = vcmp.eq.f32.partialorder %v2304_v22, %v2358_v43  ;;  %v1812_v22 = vpop.eup %1811 }
 0x463   : > { %v973_v53 = vsel %vm972_vm2, %v968_v60, inf  ;;  %v1814_v8 = vpop.eup %1813 }
 0x464   : > { %990 = vmin.xlane.f32.xlu0 %v989_v61  ;;  %974 = vmin.xlane.f32.xlu1 %v973_v53  ;;  %v1816_v38 = vpop.eup %1815  ;;  %v914_v61 = vshll.u32 %v913_v36, 16  ;;  %v929_v53 = vcvt.f32.s32 %v2342_v50  ;;  %v993_v50 = vcvt.f32.s32 %v2349_v12 }
 0x465   : > { %v1818_v33 = vpop.eup %1817 }
 0x466   : > { %v1820_v51 = vpop.eup %1819 }
 0x477   : > { %v1587_v18 = vpop.f32.mrb[16].mxu1 }
 0x478   : > { %v1588_v62 = vpop.f32.mrb[17].mxu1 }
 0x479   : > { %v1589_v63 = vadd.f32 %v1588_v62, %v1587_v18  ;;  %v1590_v1 = vpop.f32.mrb[18].mxu1 }
 0x47a   : > { %v1591_v58 = vpop.f32.mrb[19].mxu1 }
 0x47b   : > { %v1592_v2 = vadd.f32 %v1591_v58, %v1590_v1  ;;  %v1214_v7 = vmul.f32 %v1806_v0, %v1589_v63  ;;  %v961_v63 = vcvt.f32.s32 %v2340_v49  ;;  %v930_v58 = vshll.u32 %v929_v53, 16 }
 0x47c   : > { %v945_v0 = vcvt.f32.s32 %v2351_v54 }
 0x47d   : > { %v1215_v9 = vmul.f32 %v1808_v3, %v1592_v2  ;;  %v962_v3 = vshll.u32 %v961_v63, 16 }
 0x47f   : > { %v1222_v10 = vpack.c.bf16 %v1215_v9, %v1214_v7  ;;  %v1593_v11 = vpop.f32.mrb[20].mxu1 }
 0x480   : > { %v1594_v14 = vpop.f32.mrb[21].mxu1 }
 0x481   : > { %v1595_v17 = vadd.f32 %v1594_v14, %v1593_v11  ;;  %v1596_v4 = vpop.f32.mrb[22].mxu1  ;;  %1651 = vmatprep.mubr.msk.bf16.mxu0 %vm551_vm0, %v1222_v10  ;;  %v946_v10 = vshll.u32 %v945_v0, 16  ;;  %v977_v11 = vcvt.f32.s32 %v2358_v43 }
 0x482   : > { %v1597_v19 = vpop.f32.mrb[23].mxu1 }
 0x483   : > { %v1216_v20 = vmul.f32 %v1810_v5, %v1595_v17  ;;  %v1598_v21 = vadd.f32 %v1597_v19, %v1596_v4  ;;  %v994_v19 = vshll.u32 %v993_v50, 16 }
 0x485   : > { %v1217_v23 = vmul.f32 %v1812_v22, %v1598_v21 }
 0x487   : > { %v1223_v24 = vpack.c.bf16 %v1217_v23, %v1216_v20  ;;  %v1599_v25 = vpop.f32.mrb[24].mxu1  ;;  %v978_v20 = vshll.u32 %v977_v11, 16  ;;  %v1542_v23 = vld [vmem:[%s2468_s6] ss:$0 sm:$0xff] }
 0x488   : > { %v1600_v26 = vpop.f32.mrb[25].mxu1 }
 0x489   : > { %v1601_v29 = vadd.f32 %v1600_v26, %v1599_v25  ;;  %v1602_v6 = vpop.f32.mrb[26].mxu1  ;;  %1652 = vmatmul.mubr.msk.bf16.vlgmr.msra.gmra.mrb[8].mxu0 %vm551_vm0, %v1223_v24 }
 0x48a   : > { %v1603_v30 = vpop.f32.mrb[27].mxu1 }
 0x48b   : > { %v1218_v35 = vmul.f32 %v1814_v8, %v1601_v29  ;;  %v1604_v32 = vadd.f32 %v1603_v30, %v1602_v6 }
 0x48d   : > { %v1219_v39 = vmul.f32 %v1816_v38, %v1604_v32 }
 0x48f   : > { %v1224_v13 = vpack.c.bf16 %v1219_v39, %v1218_v35  ;;  %v1605_v15 = vpop.f32.mrb[28].mxu1 }
 0x490   : > { %v1606_v42 = vpop.f32.mrb[29].mxu1 }
 0x491   : > { %v1607_v45 = vadd.f32 %v1606_v42, %v1605_v15  ;;  %v1608_v44 = vpop.f32.mrb[30].mxu1  ;;  %1655 = vmatprep.mubr.msk.bf16.mxu0 %vm551_vm0, %v1224_v13 }
 0x492   : > { %v1609_v46 = vpop.f32.mrb[31].mxu1 }
 0x493   : > { %v1220_v48 = vmul.f32 %v1818_v33, %v1607_v45  ;;  %v1610_v47 = vadd.f32 %v1609_v46, %v1608_v44 }
 0x495   : > { %v1221_v55 = vmul.f32 %v1820_v51, %v1610_v47 }
 0x497   : > { %v1225_v34 = vpack.c.bf16 %v1221_v55, %v1220_v48 }
 0x499   : > { %1656 = vmatmul.mubr.msk.bf16.gmra.mrb[12].mxu0 %vm551_vm0, %v1225_v34 }
 0x4dd   : > { %v879_v16 = vpop.xlane.xlu1 %878 }
 0x4de   : > { %v880_v57 = vcvt.f32.s32 %v879_v16 }
 0x4e0   : > { %v883_v28 = vadd.s32 %v882_v27, %v880_v57 }
 0x4e1   : > { %v895_v31 = vpop.xlane.xlu0 %894 }
 0x4e2   : > { %997 = vst.msk [vmem:[%s2376_s24] sm:$0xff] %vm996_vm3, %v883_v28  ;;  %v896_v59 = vcvt.f32.s32 %v895_v31 }
 0x4e4   : > { %v899_v60 = vadd.s32 %v898_v40, %v896_v59 }
 0x4e5   : > { %v911_v41 = vpop.xlane.xlu1 %910 }
 0x4e6   : > { %998 = vst.msk [vmem:[%s2376_s24 + $0x8] sm:$0xff] %vm996_vm3, %v899_v60  ;;  %v912_v18 = vcvt.f32.s32 %v911_v41 }
 0x4e8   : > { %v915_v62 = vadd.s32 %v914_v61, %v912_v18 }
 0x4e9   : > { %v927_v1 = vpop.xlane.xlu0 %926 }
 0x4ea   : > { %999 = vst.msk [vmem:[%s2376_s24 + $0x10] sm:$0xff] %vm996_vm3, %v915_v62  ;;  %v928_v37 = vcvt.f32.s32 %v927_v1 }
 0x4ec   : > { %v931_v2 = vadd.s32 %v930_v58, %v928_v37 }
 0x4ed   : > { %v959_v7 = vpop.xlane.xlu0 %958  ;;  %v943_v9 = vpop.xlane.xlu1 %942 }
 0x4ee   : > { %1000 = vst.msk [vmem:[%s2376_s24 + $0x18] sm:$0xff] %vm996_vm3, %v931_v2  ;;  %v960_v49 = vcvt.f32.s32 %v959_v7  ;;  %v944_v54 = vcvt.f32.s32 %v943_v9 }
 0x4f0   : > { %v963_v14 = vadd.s32 %v962_v3, %v960_v49  ;;  %v947_v17 = vadd.s32 %v946_v10, %v944_v54 }
 0x4f1   : > { %v991_v4 = vpop.xlane.xlu0 %990  ;;  %v975_v5 = vpop.xlane.xlu1 %974 }
 0x4f2   : > { %1002 = vst.msk [vmem:[%s2376_s24 + $0x28] sm:$0xff] %vm996_vm3, %v963_v14  ;;  %1001 = vst.msk [vmem:[%s2376_s24 + $0x20] sm:$0xff] %vm996_vm3, %v947_v17  ;;  %v992_v12 = vcvt.f32.s32 %v991_v4  ;;  %v976_v43 = vcvt.f32.s32 %v975_v5 }
 0x4f4   : > { %v995_v21 = vadd.s32 %v994_v19, %v992_v12  ;;  %v979_v22 = vadd.s32 %v978_v20, %v976_v43 }
 0x4f6   : > { %1004 = vst.msk [vmem:[%s2376_s24 + $0x38] sm:$0xff] %vm996_vm3, %v995_v21  ;;  %1003 = vst.msk [vmem:[%s2376_s24 + $0x30] sm:$0xff] %vm996_vm3, %v979_v22  ;;  %s1902_s24 = smov [#allocation2]  }
 0x4f7   : > { %s1825_s25 = sshll.u32 %s1902_s24, 4  ;;  %s1826_s25 = int_to_ptr.vmem [resolvable:$false] %s1825_s25 }
 0x4f8   : > { %s1827_s26 = scalar_lea.vmem %s1826_s25, 2048  ;;  %p1828_p1 = scmp.lt.s32.totalorder %s2412_s19, %s1826_s25 }
 0x4f9   : > { %p1829_p2 = scmp.lt.s32.totalorder %s1827_s26, %s1821_s22 }
 0x4fb   : > { %p1830_p3 = por %p1829_p2, %p1828_p1 }
 0x4fd   : > { %p1831_p5 = pnand %p1830_p3, %p1824_p0 }
 0x55c   : > { %v1653_v24 = vpop.f32.mrb[8].mxu0 }
 0x55d   : > { %v1320_v25 = vadd.f32 %v1653_v24, %v1542_v23  ;;  %v1311_v26 = vpop.f32.mrb[9].mxu0 }
 0x55e   : > { %v1312_v29 = vadd.f32 %v1542_v23, %v1311_v26  ;;  %v1654_v6 = vpop.f32.mrb[10].mxu0 }
 0x55f   : > { %1344 = vst [vmem:[%s323_s12 + $0x10] sm:$0xff] %v1320_v25  ;;  %v1323_v8 = vadd.f32 %v1654_v6, %v1542_v23  ;;  %v1314_v30 = vpop.f32.mrb[11].mxu0 }
 0x560   : > { %1342 = vst [vmem:[%s323_s12] sm:$0xff] %v1312_v29  ;;  %v1315_v35 = vadd.f32 %v1542_v23, %v1314_v30 }
 0x561   : > { %1345 = vst [vmem:[%s323_s12 + $0x18] sm:$0xff] %v1323_v8 }
 0x562   : > { %1343 = vst [vmem:[%s323_s12 + $0x8] sm:$0xff] %v1315_v35 }
 0x56c   : > { %v1657_v32 = vpop.f32.mrb[12].mxu0 }
 0x56d   : > { %v1336_v38 = vadd.f32 %v1657_v32, %v1542_v23  ;;  %v1327_v39 = vpop.f32.mrb[13].mxu0 }
 0x56e   : > { %v1328_v13 = vadd.f32 %v1542_v23, %v1327_v39  ;;  %v1658_v15 = vpop.f32.mrb[14].mxu0 }
 0x56f   : > { %1348 = vst [vmem:[%s323_s12 + $0x30] sm:$0xff] %v1336_v38  ;;  %v1339_v42 = vadd.f32 %v1658_v15, %v1542_v23  ;;  %v1330_v45 = vpop.f32.mrb[15].mxu0 }
 0x570   : > { %1346 = vst [vmem:[%s323_s12 + $0x20] sm:$0xff] %v1328_v13  ;;  %v1331_v44 = vadd.f32 %v1542_v23, %v1330_v45 }
 0x571   : > { %1349 = vst [vmem:[%s323_s12 + $0x38] sm:$0xff] %v1339_v42 }
 0x572   : > { %1347 = vst [vmem:[%s323_s12 + $0x28] sm:$0xff] %v1331_v44 }
 0x573   : > { %1834 = shalt.err (!%p1831_p5)
}
 0x574   : > { %s1835_s23 = scalar_lea.hbm %s2410_s21, 1024  ;;  %s1839_s16 = scalar_lea.hbm %s2469_s7, 2048 }
 0x575   : > { %p1836_p6 = scmp.ne.s32.totalorder %s2410_s21, %s1835_s23  ;;  %p1840_p10 = scmp.lt.u32.totalorder %s2410_s21, %s2469_s7 }
 0x576   : > { %p1841_p11 = scmp.lt.u32.totalorder %s1839_s16, %s1835_s23  ;;  %p1843_p13 = scmp.lt.u32.totalorder %s1835_s23, %s2410_s21 }
 0x577   : > { %p1837_p7 = pnand %p1836_p6, %p1990_p4 }
 0x578   : > { %p1842_p12 = por %p1841_p11, %p1840_p10 }
 0x579   : > { %p1838_p9 = pneg %p1837_p7 }
 0x57a   : > { %p1844_p0 = por %p1843_p13, %p1842_p12 }
 0x57c   : > { %p1845_p1 = pnand %p1844_p0, %p1838_p9 }
 0x57e   : > { %1848 = shalt.err (!%p1845_p1)
}
 0x57f   : > { %s1903_s22 = smov 128   ;;  %s1904_s24 = smov 8  }
 0x580   : > { %1659 = dma.vmem_to_hbm [thread:$0]  (%p1990_p4), %s2412_s19, 1024, %s2410_s21, %s2416_s30, %s1903_s22, %s1903_s22, %s1904_s24  }
 0x581 PF: > { %p1665_p2 = scmp.ge.s32.totalorder %s1899_s10, 2  ;;  %s1394_s25 = sand.u32 1, %s1879_s27  }
 0x582   : > { %s1395_s26 = scalar_lea.sflag [#allocation3], %s1394_s25 }
 0x583   : > { %p1662_p3 = pnand %p1665_p2, %p1997_p8 }
 0x585   : > { %1874 = dma.done.wait (!%p1662_p3), %s1395_s26, 1024  }
 0x586   : > { %1876 = vsyncadd (!%p1662_p3), %s1395_s26, 4294966272  ;;  %s22_s10 = sadd.s32 1, %s1899_s10   ;;  %s2473_s27 = smov %s1883_s28 }
 0x587   : > { %p19_p5 = scmp.ge.s32.totalorder %s22_s10, 4   ;;  %s2474_s28 = smov %s1887_s29 }
 0x588   : > { %s2475_s29 = smov %s2003_s18  ;;  %s2476_s30 = smov %s1895_s9 }
 0x589   : > { %s2477_s9 = smov %s2479_s13  ;;  %21 = sbr.rel (!%p19_p5) target bundleno = 4 (0x4), region = 95 }
 0x590   :  { %1412 = vsyncpa [#allocation3], 1 }
 0x591   :  { %1414 = vsyncpa [#allocation3 + $0x1], 1 }

</bundles_post_ra>
